<compile_context>
chip_gen: v6e
topology: v6e:2x2x1
jax: 0.10.0
libtpu: 0.0.40
codegen_flags: <defaults>
</compile_context>

<pallas_src>
import functools

import jax
import jax.numpy as jnp
import numpy as np
from jax import lax
from jax.experimental import pallas as pl
from jax.experimental.pallas import tpu as pltpu

_HALO = 128                              # lane-aligned halo width (>= K - 1)
_VMEM_ESTIMATE_BUDGET = 16 * 1024 * 1024  # target per-step footprint
_VMEM_LIMIT_BYTES = 32 * 1024 * 1024      # safe on v5e/v6e/v7x


def _round_up(x, m):
    return ((x + m - 1) // m) * m


def _conv1d_relu_kernel(xl_ref, xm_ref, xr_ref, w_ref, b_ref, o_ref, *,
                        kernel_size, padding, tile_l, in_len, folded,
                        compute_dtype):
    # xl_ref: (1, C_in, HALO)    left-halo input columns  [t*TL - HALO, t*TL)
    # xm_ref: (1, C_in, TILE_L)  main input columns       [t*TL, (t+1)*TL)
    # xr_ref: (1, C_in, HALO)    right-halo input columns [(t+1)*TL, +HALO)
    # w_ref : (C_out, K*C_in) if folded else (K, C_out, C_in)
    # b_ref : (C_out, 1)
    # o_ref : (1, C_out, TILE_L) output tile (lane-dense, L on lanes)
    t = pl.program_id(1)
    base = t * tile_l - _HALO            # global input column of x_cat[:, 0]

    xl = xl_ref[0, :, :]
    xm = xm_ref[0, :, :]
    xr = xr_ref[0, :, :]
    if compute_dtype is not None:        # cast early: halves temp/vst traffic
        xl = xl.astype(compute_dtype)
        xm = xm.astype(compute_dtype)
        xr = xr.astype(compute_dtype)
    x_cat = jnp.concatenate([xl, xm, xr], axis=1)   # (C_in, TL + 2*HALO)

    # In-kernel zero padding: anything outside the real input range [0, in_len)
    # (left/right conv padding, clamped halo blocks at the edges, partial
    # trailing blocks) is forced to zero here -> no padded copy of x in HBM.
    col = base + lax.broadcasted_iota(jnp.int32, x_cat.shape, 1)
    x_cat = jnp.where((col >= 0) & (col < in_len), x_cat, 0)

    off0 = _HALO - padding               # x_cat column of (output 0, tap 0)
    if folded:
        # Sublane-aligned C_in: one MXU contraction over the im2col slab
        # (kk-major / ci-minor rows, matching the wrapper's weight reshape).
        taps = [x_cat[:, off0 + kk:off0 + kk + tile_l]
                for kk in range(kernel_size)]
        slab = jnp.concatenate(taps, axis=0) if kernel_size > 1 else taps[0]
        acc = jnp.dot(w_ref[...], slab, preferred_element_type=jnp.float32)
    else:
        # Small C_in: skip the axis-0 concat (sublane repack) and accumulate
        # K small dots instead.
        acc = jnp.zeros(o_ref.shape[1:], dtype=jnp.float32)
        for kk in range(kernel_size):
            tap = x_cat[:, off0 + kk:off0 + kk + tile_l]
            acc = acc + jnp.dot(w_ref[kk], tap,
                                preferred_element_type=jnp.float32)

    acc = acc + b_ref[...]               # (C_out, 1) broadcast
    o_ref[0, :, :] = jnp.maximum(acc, 0.0).astype(o_ref.dtype)


def conv1d_relu_pallas(x_ncl, weight, bias, *, stride=1, padding=0,
                       tile_l=2048, compute_dtype=None):
    """Conv1d(stride=1, padding=p) + ReLU.

    x_ncl:  (N, C_in, L)       float32   (PyTorch NCL layout)
    weight: (C_out, C_in, K)   float32   (PyTorch Conv1d weight layout)
    bias:   (C_out,)           float32
    returns (N, C_out, L_out)  float32
    """
    assert stride == 1, "kernel implements stride=1 (as in the module docstring)"
    n, c_in, length = x_ncl.shape
    c_out, c_in_w, k = weight.shape
    assert c_in_w == c_in
    assert k - 1 <= _HALO, "kernel_size too large for the fixed halo width"
    # TODO(synk): in-kernel padding assumes 2*padding <= k-1 ("same"/"valid"
    # style, which covers every documented Conv1dReLU config); larger paddings
    # would need an extra all-zero-tile path.
    assert 2 * padding <= k - 1, "padding > (k-1)/2 not supported by this kernel"
    out_len = length + 2 * padding - k + 1
    assert out_len > 0

    folded = (c_in >= 8) and (c_in % 8 == 0)
    cbytes = 2 if compute_dtype == jnp.bfloat16 else 4

    # --- L tiling: big lane-dense tiles, bounded by an explicit VMEM budget.
    tile_l = _round_up(min(tile_l, _round_up(out_len, _HALO)), _HALO)
    if n == 1 and out_len > _HALO:
        # v7x has 2 TensorCores sharded over "parallel" grid axes: keep >= 2
        # grid points even for single-sample inputs.
        tile_l = min(tile_l, _round_up(-(-out_len // 2), _HALO))

    def _vmem_estimate(tl):
        blocks = 2 * 4 * (c_in * tl + 2 * c_in * _HALO + c_out * tl)  # dbl-buffered DMA blocks
        blocks += 2 * 4 * (k * c_in * c_out + c_out)                  # weights + bias
        temps = c_in * (tl + 2 * _HALO) * (cbytes + 4)                # x_cat + iota mask
        temps += k * c_in * tl * cbytes                               # taps / im2col slab
        temps += 2 * c_out * tl * 4                                   # f32 acc + relu temp
        return blocks + temps

    while tile_l > _HALO and _vmem_estimate(tile_l) > _VMEM_ESTIMATE_BUDGET:
        tile_l = max(_HALO, _round_up(tile_l // 2, _HALO))

    num_tiles = -(-out_len // tile_l)
    hs = tile_l // _HALO                 # halo-blocks per main tile
    nblk_halo = -(-length // _HALO)      # number of 128-wide blocks along L

    # --- Weights/bias glue (tiny, done once).
    if folded:
        # (C_out, C_in, K) -> (C_out, K, C_in) -> (C_out, K*C_in): kk-major,
        # ci-minor columns, matching the in-kernel im2col slab row order.
        w_arr = jnp.transpose(weight, (0, 2, 1)).reshape(c_out, k * c_in)
        w_spec = pl.BlockSpec((c_out, k * c_in), lambda b, t: (0, 0))
    else:
        w_arr = jnp.transpose(weight, (2, 0, 1))            # (K, C_out, C_in)
        w_spec = pl.BlockSpec((k, c_out, c_in), lambda b, t: (0, 0, 0))
    if compute_dtype is not None:
        w_arr = w_arr.astype(compute_dtype)                 # cast once here
    b_arr = bias.reshape(c_out, 1).astype(jnp.float32)

    kernel = functools.partial(
        _conv1d_relu_kernel, kernel_size=k, padding=padding, tile_l=tile_l,
        in_len=length, folded=folded, compute_dtype=compute_dtype)

    cost = pl.CostEstimate(
        flops=2 * n * out_len * k * c_in * c_out,
        transcendentals=0,
        bytes_accessed=4 * (n * c_in * length                      # main blocks
                            + n * num_tiles * 2 * c_in * _HALO     # halo re-reads
                            + n * c_out * out_len)                 # output
        + cbytes * w_arr.size + 4 * b_arr.size,
    )

    out = pl.pallas_call(
        kernel,
        out_shape=jax.ShapeDtypeStruct((n, c_out, out_len), x_ncl.dtype),
        grid_spec=pltpu.PrefetchScalarGridSpec(
            num_scalar_prefetch=0,
            grid=(n, num_tiles),
            in_specs=[
                # left halo: previous 128 columns (clamped at t=0; masked in-kernel)
                pl.BlockSpec((1, c_in, _HALO),
                             lambda b, t: (b, 0, jnp.maximum(t * hs - 1, 0))),
                # main window: columns [t*TILE_L, (t+1)*TILE_L)
                pl.BlockSpec((1, c_in, tile_l), lambda b, t: (b, 0, t)),
                # right halo: next 128 columns (clamped at the end; masked in-kernel)
                pl.BlockSpec((1, c_in, _HALO),
                             lambda b, t: (b, 0, jnp.minimum((t + 1) * hs,
                                                             nblk_halo - 1))),
                w_spec,
                pl.BlockSpec((c_out, 1), lambda b, t: (0, 0)),
            ],
            out_specs=pl.BlockSpec((1, c_out, tile_l), lambda b, t: (b, 0, t)),
        ),
        compiler_params=pltpu.CompilerParams(
            dimension_semantics=("parallel", "parallel"),
            vmem_limit_bytes=_VMEM_LIMIT_BYTES),
        cost_estimate=cost,
    )(x_ncl, x_ncl, x_ncl, w_arr, b_arr)
    return out


def _reference_conv1d_relu(x_ncl, weight, bias, *, padding):
    out = lax.conv_general_dilated(
        x_ncl, weight,
        window_strides=(1,),
        padding=[(padding, padding)],
        dimension_numbers=("NCH", "OIH", "NCH"),
    )
    out = out + bias[None, :, None]
    return jnp.maximum(out, 0.0)


if __name__ == "__main__":
    key = jax.random.PRNGKey(0)

    # (N, C_in, C_out, L, K, pad, tile_l, compute_dtype, tol) — covers the
    # module's documented (K, pad) combos, a multi-tile case exercising real
    # left/right halos, the folded (C_in % 8 == 0) im2col path, and bf16.
    configs = [
        (2, 4, 8, 16, 3, 1, 2048, None, 1e-5),
        (2, 4, 8, 16, 5, 2, 2048, None, 1e-5),
        (2, 4, 8, 16, 7, 3, 2048, None, 1e-5),
        (2, 4, 8, 300, 3, 1, 128, None, 1e-5),
        (2, 16, 8, 300, 5, 2, 128, None, 1e-5),
        (2, 4, 8, 300, 3, 1, 256, jnp.bfloat16, 5e-2),
    ]

    for idx, (N, C_IN, C_OUT, L, K, PAD, TL, CDT, TOL) in enumerate(configs):
        kx, kw, kb = jax.random.split(jax.random.fold_in(key, idx), 3)
        x = jax.random.normal(kx, (N, C_IN, L), dtype=jnp.float32)
        bound = 1.0 / np.sqrt(C_IN * K)
        weight = jax.random.uniform(kw, (C_OUT, C_IN, K),
                                    minval=-bound, maxval=bound,
                                    dtype=jnp.float32)
        bias = jax.random.uniform(kb, (C_OUT,),
                                  minval=-bound, maxval=bound,
                                  dtype=jnp.float32)

        out = conv1d_relu_pallas(x, weight, bias, stride=1, padding=PAD,
                                 tile_l=TL, compute_dtype=CDT)
        out = jax.block_until_ready(out)

        ref = _reference_conv1d_relu(x, weight, bias, padding=PAD)
        out_len = L + 2 * PAD - K + 1
        assert out.shape == (N, C_OUT, out_len), out.shape
        np.testing.assert_allclose(np.asarray(out), np.asarray(ref),
                                   rtol=TOL, atol=TOL)

    print("KERNEL_OK")
</pallas_src>

<mosaic_0001>
module attributes {stable_mosaic.version = 11 : i64} {
  func.func @_conv1d_relu_kernel(%arg0: i32, %arg1: i32, %arg2: memref<1x4x128xf32, #tpu.memory_space<vmem>>, %arg3: memref<1x4x128xf32, #tpu.memory_space<vmem>>, %arg4: memref<1x4x128xf32, #tpu.memory_space<vmem>>, %arg5: memref<3x8x4xf32, #tpu.memory_space<vmem>>, %arg6: memref<8x1xf32, #tpu.memory_space<vmem>>, %arg7: memref<1x8x128xf32, #tpu.memory_space<vmem>>) attributes {dimension_semantics = [#tpu.dimension_semantics<parallel>, #tpu.dimension_semantics<parallel>], iteration_bounds = array<i64: 2, 1>, scalar_prefetch = 0 : i64, scratch_operands = 0 : i64, tpu.core_type = #tpu.core_type<tc>, window_params = [{transform_indices = @transform_0, window_bounds = array<i64: 1, 4, 128>}, {transform_indices = @transform_1, window_bounds = array<i64: 1, 4, 128>}, {transform_indices = @transform_2, window_bounds = array<i64: 1, 4, 128>}, {pipeline_mode = #tpu.pipeline_mode<synchronous>, transform_indices = @transform_3, window_bounds = array<i64: 3, 8, 4>}, {pipeline_mode = #tpu.pipeline_mode<synchronous>, transform_indices = @transform_4, window_bounds = array<i64: 8, 1>}, {transform_indices = @transform_5, window_bounds = array<i64: 1, 8, 128>}]} {
    %c128_i32 = arith.constant 128 : i32
    %0 = arith.muli %arg1, %c128_i32 : i32
    %c128_i32_0 = arith.constant 128 : i32
    %1 = arith.subi %0, %c128_i32_0 : i32
    %c0 = arith.constant 0 : index
    %c0_1 = arith.constant 0 : index
    %c0_2 = arith.constant 0 : index
    %2 = vector.load %arg2[%c0, %c0_1, %c0_2] : memref<1x4x128xf32, #tpu.memory_space<vmem>>, vector<1x4x128xf32>
    %3 = vector.shape_cast %2 : vector<1x4x128xf32> to vector<4x128xf32>
    %c0_3 = arith.constant 0 : index
    %c0_4 = arith.constant 0 : index
    %c0_5 = arith.constant 0 : index
    %4 = vector.load %arg3[%c0_3, %c0_4, %c0_5] : memref<1x4x128xf32, #tpu.memory_space<vmem>>, vector<1x4x128xf32>
    %5 = vector.shape_cast %4 : vector<1x4x128xf32> to vector<4x128xf32>
    %c0_6 = arith.constant 0 : index
    %c0_7 = arith.constant 0 : index
    %c0_8 = arith.constant 0 : index
    %6 = vector.load %arg4[%c0_6, %c0_7, %c0_8] : memref<1x4x128xf32, #tpu.memory_space<vmem>>, vector<1x4x128xf32>
    %7 = vector.shape_cast %6 : vector<1x4x128xf32> to vector<4x128xf32>
    %8 = tpu.concatenate %3, %5, %7 in 1 : vector<4x128xf32>, vector<4x128xf32>, vector<4x128xf32> -> vector<4x384xf32>
    %9 = tpu.iota {dimensions = array<i32: 1>} : vector<4x384xi32>
    %10 = vector.broadcast %1 : i32 to vector<4x384xi32>
    %11 = arith.addi %10, %9 : vector<4x384xi32>
    %c0_i32 = arith.constant 0 : i32
    %12 = vector.broadcast %c0_i32 : i32 to vector<4x384xi32>
    %13 = arith.cmpi sge, %11, %12 : vector<4x384xi32>
    %c16_i32 = arith.constant 16 : i32
    %14 = vector.broadcast %c16_i32 : i32 to vector<4x384xi32>
    %15 = arith.cmpi slt, %11, %14 : vector<4x384xi32>
    %16 = arith.andi %13, %15 : vector<4x384xi1>
    %c0_i32_9 = arith.constant 0 : i32
    %17 = arith.sitofp %c0_i32_9 : i32 to f32
    %18 = vector.broadcast %17 : f32 to vector<4x384xf32>
    %19 = arith.select %16, %8, %18 : vector<4x384xi1>, vector<4x384xf32>
    %cst = arith.constant 0.000000e+00 : f32
    %20 = vector.broadcast %cst : f32 to vector<8x128xf32>
    %21 = vector.extract_strided_slice %19 {offsets = [0, 127], sizes = [4, 128], strides = [1, 1]} : vector<4x384xf32> to vector<4x128xf32>
    %c0_10 = arith.constant 0 : index
    %c0_11 = arith.constant 0 : index
    %c0_12 = arith.constant 0 : index
    %22 = vector.load %arg5[%c0_10, %c0_11, %c0_12] : memref<3x8x4xf32, #tpu.memory_space<vmem>>, vector<1x8x4xf32>
    %23 = vector.shape_cast %22 : vector<1x8x4xf32> to vector<8x4xf32>
    %cst_13 = arith.constant dense<0.000000e+00> : vector<8x128xf32>
    %24 = tpu.matmul %23, %21, %cst_13 {dimension_numbers = #tpu.dot_dimension_numbers<[1], [0], [0], [1], [0, 0, 1, 1], [], []>} : vector<8x4xf32>, vector<4x128xf32>, vector<8x128xf32> -> vector<8x128xf32>
    %25 = arith.addf %20, %24 : vector<8x128xf32>
    %26 = vector.extract_strided_slice %19 {offsets = [0, 128], sizes = [4, 128], strides = [1, 1]} : vector<4x384xf32> to vector<4x128xf32>
    %c1 = arith.constant 1 : index
    %c0_14 = arith.constant 0 : index
    %c0_15 = arith.constant 0 : index
    %27 = vector.load %arg5[%c1, %c0_14, %c0_15] : memref<3x8x4xf32, #tpu.memory_space<vmem>>, vector<1x8x4xf32>
    %28 = vector.shape_cast %27 : vector<1x8x4xf32> to vector<8x4xf32>
    %cst_16 = arith.constant dense<0.000000e+00> : vector<8x128xf32>
    %29 = tpu.matmul %28, %26, %cst_16 {dimension_numbers = #tpu.dot_dimension_numbers<[1], [0], [0], [1], [0, 0, 1, 1], [], []>} : vector<8x4xf32>, vector<4x128xf32>, vector<8x128xf32> -> vector<8x128xf32>
    %30 = arith.addf %25, %29 : vector<8x128xf32>
    %31 = vector.extract_strided_slice %19 {offsets = [0, 129], sizes = [4, 128], strides = [1, 1]} : vector<4x384xf32> to vector<4x128xf32>
    %c2 = arith.constant 2 : index
    %c0_17 = arith.constant 0 : index
    %c0_18 = arith.constant 0 : index
    %32 = vector.load %arg5[%c2, %c0_17, %c0_18] : memref<3x8x4xf32, #tpu.memory_space<vmem>>, vector<1x8x4xf32>
    %33 = vector.shape_cast %32 : vector<1x8x4xf32> to vector<8x4xf32>
    %cst_19 = arith.constant dense<0.000000e+00> : vector<8x128xf32>
    %34 = tpu.matmul %33, %31, %cst_19 {dimension_numbers = #tpu.dot_dimension_numbers<[1], [0], [0], [1], [0, 0, 1, 1], [], []>} : vector<8x4xf32>, vector<4x128xf32>, vector<8x128xf32> -> vector<8x128xf32>
    %35 = arith.addf %30, %34 : vector<8x128xf32>
    %c0_20 = arith.constant 0 : index
    %c0_21 = arith.constant 0 : index
    %36 = vector.load %arg6[%c0_20, %c0_21] : memref<8x1xf32, #tpu.memory_space<vmem>>, vector<8x1xf32>
    %37 = vector.broadcast %36 : vector<8x1xf32> to vector<8x128xf32>
    %38 = arith.addf %35, %37 : vector<8x128xf32>
    %cst_22 = arith.constant 0.000000e+00 : f32
    %39 = vector.broadcast %cst_22 : f32 to vector<8x128xf32>
    %40 = arith.maximumf %38, %39 : vector<8x128xf32>
    %c0_23 = arith.constant 0 : index
    %c0_24 = arith.constant 0 : index
    %c0_25 = arith.constant 0 : index
    %41 = vector.load %arg7[%c0_23, %c0_24, %c0_25] : memref<1x8x128xf32, #tpu.memory_space<vmem>>, vector<1x8x128xf32>
    %42 = vector.shape_cast %41 : vector<1x8x128xf32> to vector<8x128xf32>
    %43 = vector.shape_cast %40 : vector<8x128xf32> to vector<1x8x128xf32>
    tpu.vector_store %arg7[%c0_23, %c0_24, %c0_25], %43 {strides = array<i32>} : memref<1x8x128xf32, #tpu.memory_space<vmem>>, vector<1x8x128xf32>,
    return
  }
  func.func @transform_0(%arg0: i32, %arg1: i32) -> (i32, i32, i32) {
    %c1_i32 = arith.constant 1 : i32
    %0 = arith.muli %arg1, %c1_i32 : i32
    %c1_i32_0 = arith.constant 1 : i32
    %1 = arith.subi %0, %c1_i32_0 : i32
    %c0_i32 = arith.constant 0 : i32
    %2 = arith.maxsi %1, %c0_i32 : i32
    %c0_i32_1 = arith.constant 0 : i32
    %c0_i32_2 = arith.constant 0 : i32
    return %arg0, %c0_i32_1, %2 : i32, i32, i32
  }
  func.func @transform_1(%arg0: i32, %arg1: i32) -> (i32, i32, i32) {
    %c0_i32 = arith.constant 0 : i32
    %c0_i32_0 = arith.constant 0 : i32
    return %arg0, %c0_i32, %arg1 : i32, i32, i32
  }
  func.func @transform_2(%arg0: i32, %arg1: i32) -> (i32, i32, i32) {
    %c1_i32 = arith.constant 1 : i32
    %0 = arith.addi %arg1, %c1_i32 : i32
    %c1_i32_0 = arith.constant 1 : i32
    %1 = arith.muli %0, %c1_i32_0 : i32
    %c0_i32 = arith.constant 0 : i32
    %2 = arith.minsi %1, %c0_i32 : i32
    %c0_i32_1 = arith.constant 0 : i32
    %c0_i32_2 = arith.constant 0 : i32
    return %arg0, %c0_i32_1, %2 : i32, i32, i32
  }
  func.func @transform_3(%arg0: i32, %arg1: i32) -> (i32, i32, i32) {
    %c0_i32 = arith.constant 0 : i32
    %c0_i32_0 = arith.constant 0 : i32
    %c0_i32_1 = arith.constant 0 : i32
    %c0_i32_2 = arith.constant 0 : i32
    return %c0_i32, %c0_i32_0, %c0_i32_1 : i32, i32, i32
  }
  func.func @transform_4(%arg0: i32, %arg1: i32) -> (i32, i32) {
    %c0_i32 = arith.constant 0 : i32
    %c0_i32_0 = arith.constant 0 : i32
    %c0_i32_1 = arith.constant 0 : i32
    return %c0_i32, %c0_i32_0 : i32, i32
  }
  func.func @transform_5(%arg0: i32, %arg1: i32) -> (i32, i32, i32) {
    %c0_i32 = arith.constant 0 : i32
    %c0_i32_0 = arith.constant 0 : i32
    return %arg0, %c0_i32, %arg1 : i32, i32, i32
  }
}

</mosaic_0001>

<bundles_post_ra>
// kernel: tpu_custom_call.1
= control target key start
LH: loop header
LB: loop body
LE: loop exit
PB: predicated region body
PF: predicated region fallthrough
CT: control target
= control target key end

     0   :  { %10 = vsyncpa [#allocation3], 0  ;;  %s1078_s0 = inlined_call_operand.vmem [shape: f32[2,4,16], index: 0, kind: input, shape index: {}]   ;;  %s1079_s1 = inlined_call_operand.vmem [shape: f32[2,4,16], index: 1, kind: input, shape index: {}]   ;;  %s1080_s2 = inlined_call_operand.vmem [shape: f32[2,4,16], index: 2, kind: input, shape index: {}]   ;;  %s1081_s3 = inlined_call_operand.vmem [shape: f32[3,8,4], index: 3, kind: input, shape index: {}]   ;;  %s1082_s4 = inlined_call_operand.vmem [shape: f32[8,1], index: 4, kind: input, shape index: {}]   ;;  %s1083_s5 = inlined_call_operand.hbm [shape: f32[2,8,16], index: 5, kind: output, shape index: {}]  }
   0x1   :  { %12 = vsyncpa [#allocation3 + $0x1], 0  ;;  %s958_s18 = smov 0   ;;  %s960_s0 = smov 0  }
   0x2   :  { %s962_s19 = smov 0   ;;  %s964_s20 = smov 0  }
   0x3   :  { %s966_s2 = smov 0   ;;  %s968_s21 = smov 0  }
   0x4 LB: > { %s741_s22 = sadd.s32 4294967295, %s920_s21   ;;  %s742_s23 = sadd.s32 4294967294, %s920_s21   ;;  %s920_s21 = sphi %s968_s21, %s18_s21   ;;  %s916_s2 = sphi %s966_s2, %s1090_s2   ;;  %s912_s20 = sphi %s964_s20, %s1089_s20   ;;  %s908_s19 = sphi %s962_s19, %s1088_s19   ;;  %s904_s0 = sphi %s960_s0, %s1087_s0   ;;  %s900_s18 = sphi %s958_s18, %s1086_s18  }
   0x5   : > { %s30_s24 = sadd.s32 1, %s916_s2  ;;  %s177_s25 = sadd.s32 1, %s908_s19 }
   0x6   : > { %p32_p0 = scmp.ge.s32.totalorder %s30_s24, 2  ;;  %p187_p1 = scmp.ne.s32.totalorder %s908_s19, %s904_s0 }
   0x7   : > { %p188_p2 = scmp.eq.s32.totalorder %s741_s22, 1  ;;  %p193_p3 = scmp.ne.s32.totalorder %s904_s0, %s900_s18 }
   0x8   : > { %s1092_s24 = smov (%p32_p0, %s30_s24), 0  ;;  %p194_p5 = scmp.eq.s32.totalorder %s742_s23, 1 }
   0x9   : > { %p998_p4 = por %p188_p2, %p187_p1  ;;  %s172_s27 = ssub.s32 %s916_s2, %s1092_s24 }
   0xa   : > { %p745_p6 = scmp.ge.s32.totalorder %s920_s21, 1  ;;  %p175_p7 = scmp.eq.s32.totalorder %s172_s27, 0 }
   0xb   : > { %p1005_p8 = por %p194_p5, %p193_p3  ;;  %p260_p9 = scmp.lt.s32.totalorder %s920_s21, 3 }
   0xc   : > { %s1011_s29 = scalar_select %p175_p7, %s908_s19, %s177_s25  }
   0xd   : > { %p261_p10 = pnand %p745_p6, %p260_p9 }
   0xe   : > { %p323_p11 = scmp.lt.s32.totalorder (!%p261_p10), %s912_s20, 1  ;;  %s923_s30 = smov (!%p261_p10), 1  }
   0xf   : > { %264 = sbr.rel (%p261_p10) target bundleno = 363 (0x16b), region = 40  ;;  %s926_s13 = smov (!%p261_p10), 127  }
  0x10   : > { %s307_s25 = sand.u32 (!%p261_p10), 1, %s904_s0  }
  0x11   : > { %s746_s27 = sshll.u32 (!%p261_p10), %s307_s25, 3  ;;  %s626_s11 = scalar_lea.sflag (!%p261_p10), [#allocation3], %s307_s25 }
  0x14   : > { %v348_v0 = vlaneseq  ;;  %v922_v1 = vmov 0.0   ;;  %s324_s6 = scalar_select %p323_p11, %s912_s20, 1  ;;  %vm924_vm0 = vmmov 0   ;;  %v925_v4 = vmov 0   ;;  %v750_v8 = vld [vmem:[%s1081_s3 + $0x8] sm:$0xff]  ;;  %v616_v9 = vld [vmem:[%s1082_s4] sm:$0xff] }
  0x15   : > { %450 = vrot.lane.b32.xlu0 %v922_v1, %s923_s30  ;;  %768 = vmatprep.subr.mxu0 %v922_v1  ;;  %vm375_vm2 = vcmask 1043456   ;;  %vm371_vm3 = vcmask 31744   ;;  %vm454_vm4 = vcmask 7168   ;;  %v368_v13 = vld [vmem:[%s1081_s3] sm:$0xff]  ;;  %vm538_vm5 = vcmask 1039360   ;;  %v755_v16 = vld [vmem:[%s1081_s3 + $0x10] sm:$0xff] }
  0x16   : > { %v349_v2 = vand.u32 127, %v348_v0  ;;  %773 = vmatprep.subr.mxu1 %v922_v1  ;;  %770 = vmatprep.mubr.msk.f32.mxu0 %vm924_vm0, %v922_v1  ;;  %s748_s7 = sshll.u32 %s324_s6, 2  ;;  %s309_s6 = scalar_lea.vmem [#allocation2], %s746_s27 }
  0x17   : > { %775 = vmatprep.mubr.msk.f32.mxu1 %vm924_vm0, %v922_v1  ;;  %843 = vset.pattern.permute.xlu0 %v925_v4  ;;  %s329_s10 = scalar_lea.vmem %s1079_s1, %s748_s7  ;;  %s640_s7 = sshll.u32 %s309_s6, 4  ;;  %s641_s7 = int_to_ptr.vmem [resolvable:$true] %s640_s7 }
  0x18   : > { %v350_v3 = vadd.s32 128, %v349_v2  ;;  %v346_v5 = vld [vmem:[%s329_s10] sm:$0xf]  ;;  %s844_s12 = scalar_lea.vmem %s641_s7, 128 }
  0x19   : > { %p845_p12 = scmp.ne.s32.totalorder %s641_s7, %s844_s12 }
  0x1a   : > { %v354_v6 = vadd.s32 4294967168, %v350_v3 }
  0x1b   : > { %p846_p13 = pnand %p845_p12, %p998_p4 }
  0x1c   : > { %vm360_vm1 = vcmp.lt.s32.totalorder %v354_v6, 16 }
  0x1d   : > { %v366_v7 = vsel %vm360_vm1, %v346_v5, 0.0  ;;  %p847_p0 = pneg %p846_p13 }
  0x1e   : > { %534 = vrot.lane.b32.xlu1 %v366_v7, %s926_s13  ;;  %452 = vrot.lane.b32.xlu0 %v366_v7, %s923_s30  ;;  %s759_s30 = sshll.u32 %s912_s20, 7 }
  0x1f   : > { %769 = vmatpush3.msk.msra.mxu0 %vm375_vm2, %v366_v7  ;;  %s638_s10 = scalar_lea.hbm %s1083_s5, %s759_s30 }
  0x20   : > { %771 = vmatmul.mubr.msk.f32.vlgmr.msra.gmra.mxu0 %vm371_vm3, %v750_v8  ;;  %778 = vmatprep.subr.mxu0 %v922_v1 }
  0x21   : > { %780 = vmatprep.mubr.msk.f32.mxu0 %vm924_vm0, %v922_v1 }
  0x22   : > { %536 = vrot.lane.b32.xlu1 %v922_v1, %s926_s13  ;;  %619 = vperm.xlu0 %843, %v616_v9   ;;  %s927_s13 = smov [#allocation2]  }
  0x23   : > { %s848_s14 = sshll.u32 %s927_s13, 4  ;;  %s849_s14 = int_to_ptr.vmem [resolvable:$false] %s848_s14 }
  0x24   : > { %s850_s20 = scalar_lea.vmem %s849_s14, 256  ;;  %p851_p1 = scmp.lt.s32.totalorder %s641_s7, %s849_s14 }
  0x25   : > { %p852_p2 = scmp.lt.s32.totalorder %s850_s20, %s844_s12 }
  0x27   : > { %p853_p3 = por %p852_p2, %p851_p1 }
  0x29   : > { %p854_p5 = pnand %p853_p3, %p847_p0 }
  0x87   : > { %v451_v10 = vpop.permute.xlu0 %450 }
  0x90   : > { %v535_v11 = vpop.permute.xlu1 %534  ;;  %v453_v12 = vpop.permute.xlu0 %452 }
  0x91   : > { %v455_v14 = vsel %vm454_vm4, %v451_v10, %v453_v12 }
  0x92   : > { %774 = vmatpush3.msk.msra.mxu1 %vm375_vm2, %v455_v14 }
  0x93   : > { %776 = vmatmul.mubr.msk.f32.vlgmr.msra.gmra.mxu1 %vm371_vm3, %v368_v13 }
  0x94   : > { %v537_v15 = vpop.permute.xlu1 %536 }
  0x95   : > { %v539_v17 = vsel %vm538_vm5, %v535_v11, %v537_v15 }
  0x96   : > { %779 = vmatpush3.msk.msra.mxu0 %vm375_vm2, %v539_v17 }
  0x97   : > { %781 = vmatmul.mubr.msk.f32.vlgmr.msra.gmra.mxu0 %vm371_vm3, %v755_v16 }
  0x9d   : > { %v620_v24 = vpop.permute.xlu0 %619 }
  0xe0   : > { %v445_v18 = vpop.f32.mrf.mxu0 }
  0xe2   : > { %v772_v19 = vpop.f32.mrf.mxu0 }
 0x153   : > { %v527_v20 = vpop.f32.mrf.mxu1 }
 0x154   : > { %v528_v22 = vadd.f32 %v527_v20, %v445_v18 }
 0x155   : > { %v777_v21 = vpop.f32.mrf.mxu1 }
 0x157   : > { %v611_v23 = vpop.f32.mrf.mxu0 }
 0x158   : > { %v615_v25 = vadd.f32 %v611_v23, %v528_v22 }
 0x159   : > { %v782_v26 = vpop.f32.mrf.mxu0 }
 0x15a   : > { %v622_v27 = vadd.f32 %v620_v24, %v615_v25 }
 0x15c   : > { %v623_v28 = vmax.f32 %v622_v27, 0.0 }
 0x15e   : > { %624 = vst [vmem:[%s309_s6] sm:$0xff] %v623_v28 }
 0x15f   : > { %857 = shalt.err (!%p854_p5)
}
 0x160   : > { %s858_s15 = scalar_lea.hbm %s638_s10, 128  ;;  %s862_s22 = scalar_lea.hbm %s1083_s5, 256 }
 0x161   : > { %p859_p6 = scmp.ne.s32.totalorder %s638_s10, %s858_s15  ;;  %p863_p10 = scmp.lt.s32.totalorder %s638_s10, %s1083_s5 }
 0x162   : > { %p864_p11 = scmp.lt.s32.totalorder %s862_s22, %s858_s15 }
 0x163   : > { %p860_p7 = pnand %p859_p6, %p998_p4 }
 0x164   : > { %p865_p12 = por %p864_p11, %p863_p10 }
 0x165   : > { %p861_p9 = pneg %p860_p7 }
 0x167   : > { %p866_p13 = pnand %p865_p12, %p861_p9 }
 0x169   : > { %869 = shalt.err (!%p866_p13)
}
 0x16a   : > { %783 = dma.vmem_to_hbm [thread:$0]  (%p998_p4), %s641_s7, 128, %s638_s10, %s626_s11  }
 0x16b PF: > { %p789_p0 = scmp.ge.s32.totalorder %s920_s21, 2  ;;  %s652_s27 = sand.u32 1, %s900_s18  }
 0x16c   : > { %s653_s30 = scalar_lea.sflag [#allocation3], %s652_s27 }
 0x16d   : > { %p786_p1 = pnand %p789_p0, %p1005_p8 }
 0x16f   : > { %p787_p2 = pneg %p786_p1 }
 0x171   : > { %895 = dma.done.wait (%p787_p2), %s653_s30, 128  }
 0x172   : > { %897 = vsyncadd (%p787_p2), %s653_s30, 4294967168  ;;  %s18_s21 = sadd.s32 1, %s920_s21   ;;  %s1086_s18 = smov %s904_s0 }
 0x173   : > { %p15_p3 = scmp.ge.s32.totalorder %s18_s21, 4   ;;  %s1087_s0 = smov %s908_s19 }
 0x174   : > { %s1088_s19 = smov %s1011_s29  ;;  %s1089_s20 = smov %s916_s2 }
 0x175   : > { %s1090_s2 = smov %s1092_s24  ;;  %17 = sbr.rel (!%p15_p3) target bundleno = 4 (0x4), region = 83 }
 0x17a   :  { %658 = vsyncpa [#allocation3], 1 }
 0x17b   :  { %660 = vsyncpa [#allocation3 + $0x1], 1 }

</bundles_post_ra>
